<compile_context>
chip_gen: v7x
topology: tpu7x:2x2x1
jax: 0.10.0
libtpu: 0.0.40
codegen_flags: <defaults>
</compile_context>

<pallas_src>
import jax
import jax.numpy as jnp
from jax.experimental import pallas as pl
from jax.experimental.pallas import tpu as pltpu

LANE = 128            # TPU vreg lane width
SUBLANE = 8           # TPU vreg sublane count
MAX_BATCH_TILE = 8192  # ~10 MiB/step working set -> fits v7x 32 MiB scoped VMEM

# CORE_PARALLEL shards the batch grid axis across v7x's two TensorCores;
# ignored on single-TC v5e/v6e. Fall back to "parallel" if the enum is absent.
_BATCH_SEMANTIC = getattr(pltpu, "CORE_PARALLEL", "parallel")


def _round_up(n, m):
    return ((n + m - 1) // m) * m


def _qnet_kernel(x_ref, w1_ref, b1_ref, w2_ref, b2_ref, out_ref):
    # Hidden layer: h = relu(x @ W1 + b1). hidden is lane-padded to 128, so the
    # bias add + ReLU are lane-dense VPU ops; matmul accumulates in f32 on MXU.
    h = jnp.dot(x_ref[...], w1_ref[...], preferred_element_type=jnp.float32)
    h = jnp.maximum(h + b1_ref[...], 0.0)
    # Output layer: computed 128-wide in VMEM, stored at the true output width
    # (narrow masked store is negligible next to the saved HBM writeback).
    y = jnp.dot(h, w2_ref[...], preferred_element_type=jnp.float32) + b2_ref[...]
    out_ref[...] = y[:, : out_ref.shape[1]].astype(out_ref.dtype)


def prepare_qnet_params(w1, b1, w2, b2):
    """Pad feature (lane) dims to multiples of 128 ONCE, at init.

    Zero-padded W1/b1 columns and W2 rows keep the math bit-identical.
    Returns (w1p, b1p, w2p, b2p, out_size) to be reused by every forward call.
    """
    in_size, hidden = w1.shape
    out_size = w2.shape[1]
    h_pad = _round_up(hidden, LANE)
    o_pad = _round_up(out_size, LANE)
    w1p = jnp.zeros((in_size, h_pad), w1.dtype).at[:, :hidden].set(w1)
    b1p = jnp.zeros((1, h_pad), b1.dtype).at[:, :hidden].set(b1.reshape(1, -1))
    w2p = jnp.zeros((h_pad, o_pad), w2.dtype).at[:hidden, :out_size].set(w2)
    b2p = jnp.zeros((1, o_pad), b2.dtype).at[:, :out_size].set(b2.reshape(1, -1))
    return (w1p, b1p, w2p, b2p, out_size)


def linear_qnet_forward(x, params, *, batch_tile=MAX_BATCH_TILE):
    """Fused forward pass: relu(x @ W1 + b1) @ W2 + b2.

    Small batches (B <= batch_tile): single ungridded invocation.
    Large batches: batch-tiled grid, weights VMEM-resident, ragged tail handled
    by Pallas OOB masking (no explicit padding of x or the output).
    """
    w1p, b1p, w2p, b2p, out_size = params
    B, in_size = x.shape
    h_pad = w1p.shape[1]
    o_pad = w2p.shape[1]

    itemsize = jnp.dtype(x.dtype).itemsize
    weight_bytes = sum(int(a.size) * jnp.dtype(a.dtype).itemsize
                       for a in (w1p, b1p, w2p, b2p))

    def cost(rows):
        # Consistent with what the kernel actually does: padded compute dims,
        # true out_size store width.
        return pl.CostEstimate(
            flops=2 * rows * (in_size * h_pad + h_pad * o_pad),
            transcendentals=0,
            bytes_accessed=(rows * in_size * itemsize
                            + weight_bytes
                            + B * out_size * itemsize),
        )

    tb = min(_round_up(B, SUBLANE), _round_up(batch_tile, SUBLANE))

    if B <= tb:
        # Small batch: no grid at all -> no per-step grid/DMA bookkeeping.
        return pl.pallas_call(
            _qnet_kernel,
            out_shape=jax.ShapeDtypeStruct((B, out_size), x.dtype),
            in_specs=[
                pl.BlockSpec(x.shape, lambda: (0, 0)),
                pl.BlockSpec(w1p.shape, lambda: (0, 0)),
                pl.BlockSpec(b1p.shape, lambda: (0, 0)),
                pl.BlockSpec(w2p.shape, lambda: (0, 0)),
                pl.BlockSpec(b2p.shape, lambda: (0, 0)),
            ],
            out_specs=pl.BlockSpec((B, out_size), lambda: (0, 0)),
            cost_estimate=cost(B),
        )(x, w1p, b1p, w2p, b2p)

    # Batch-tiled path (training / replay batches). Weights (~70 KB) stay
    # VMEM-resident across the loop (index_map -> (0, 0)); only activations
    # stream. Ragged tail: OOB reads are unspecified but only feed output rows
    # >= B, whose stores Pallas masks, so nothing past B touches HBM.
    n_steps = pl.cdiv(B, tb)
    return pl.pallas_call(
        _qnet_kernel,
        out_shape=jax.ShapeDtypeStruct((B, out_size), x.dtype),
        grid=(n_steps,),
        in_specs=[
            pl.BlockSpec((tb, in_size), lambda i: (i, 0)),
            pl.BlockSpec(w1p.shape, lambda i: (0, 0)),
            pl.BlockSpec(b1p.shape, lambda i: (0, 0)),
            pl.BlockSpec(w2p.shape, lambda i: (0, 0)),
            pl.BlockSpec(b2p.shape, lambda i: (0, 0)),
        ],
        out_specs=pl.BlockSpec((tb, out_size), lambda i: (i, 0)),
        compiler_params=pltpu.CompilerParams(
            dimension_semantics=(_BATCH_SEMANTIC,)),
        cost_estimate=cost(n_steps * tb),
    )(x, w1p, b1p, w2p, b2p)


def init_params(key, input_size, hidden_size, output_size, dtype=jnp.float32):
    """Deterministic init mimicking PyTorch nn.Linear: U(-1/sqrt(fan_in), 1/sqrt(fan_in))."""
    k1, k2, k3, k4 = jax.random.split(key, 4)
    lim1 = 1.0 / jnp.sqrt(jnp.float32(input_size))
    lim2 = 1.0 / jnp.sqrt(jnp.float32(hidden_size))
    w1 = jax.random.uniform(k1, (input_size, hidden_size), dtype, -lim1, lim1)
    b1 = jax.random.uniform(k2, (1, hidden_size), dtype, -lim1, lim1)
    w2 = jax.random.uniform(k3, (hidden_size, output_size), dtype, -lim2, lim2)
    b2 = jax.random.uniform(k4, (1, output_size), dtype, -lim2, lim2)
    return w1, b1, w2, b2


# TODO(synk): save()/load() checkpoint I/O from the PyTorch module is host-side
# file handling with no Pallas equivalent; omitted.

if __name__ == "__main__":
    input_size, hidden_size, output_size = 16, 32, 4
    key = jax.random.PRNGKey(0)
    kx, kp, kx2 = jax.random.split(key, 3)
    w1, b1, w2, b2 = init_params(kp, input_size, hidden_size, output_size)
    params = prepare_qnet_params(w1, b1, w2, b2)   # pad once, reuse every call

    def ref_fwd(x):
        return jnp.maximum(x @ w1 + b1, 0.0) @ w2 + b2

    # Small-batch (ungridded, per-game-step inference) path.
    batch = 8
    x = jax.random.normal(kx, (batch, input_size), jnp.float32)
    out = jax.block_until_ready(linear_qnet_forward(x, params))
    assert out.shape == (batch, output_size)
    assert jnp.allclose(out, ref_fwd(x), atol=1e-5, rtol=1e-5)

    # Batch-tiled (training) path with a ragged tail tile (300 = 2*128 + 44).
    # batch_tile is overridden small here only to exercise the grid at test
    # shapes; the default auto-picked tile is 8192 rows.
    batch2 = 300
    x2 = jax.random.normal(kx2, (batch2, input_size), jnp.float32)
    out2 = jax.block_until_ready(linear_qnet_forward(x2, params, batch_tile=128))
    assert out2.shape == (batch2, output_size)
    assert jnp.allclose(out2, ref_fwd(x2), atol=1e-5, rtol=1e-5)

    print("KERNEL_OK")
</pallas_src>

<mosaic_0001>
module attributes {stable_mosaic.version = 11 : i64} {
  func.func @_qnet_kernel(%arg0: memref<8x16xf32, #tpu.memory_space<vmem>>, %arg1: memref<16x128xf32, #tpu.memory_space<vmem>>, %arg2: memref<1x128xf32, #tpu.memory_space<vmem>>, %arg3: memref<128x128xf32, #tpu.memory_space<vmem>>, %arg4: memref<1x128xf32, #tpu.memory_space<vmem>>, %arg5: memref<8x4xf32, #tpu.memory_space<vmem>>) attributes {dimension_semantics = [], scalar_prefetch = 0 : i64, scratch_operands = 0 : i64, tpu.core_type = #tpu.core_type<tc>} {
    %c0 = arith.constant 0 : index
    %c0_0 = arith.constant 0 : index
    %0 = vector.load %arg0[%c0, %c0_0] : memref<8x16xf32, #tpu.memory_space<vmem>>, vector<8x16xf32>
    %c0_1 = arith.constant 0 : index
    %c0_2 = arith.constant 0 : index
    %1 = vector.load %arg1[%c0_1, %c0_2] : memref<16x128xf32, #tpu.memory_space<vmem>>, vector<16x128xf32>
    %cst = arith.constant dense<0.000000e+00> : vector<8x128xf32>
    %2 = tpu.matmul %0, %1, %cst {dimension_numbers = #tpu.dot_dimension_numbers<[1], [0], [0], [1], [0, 0, 1, 1], [], []>} : vector<8x16xf32>, vector<16x128xf32>, vector<8x128xf32> -> vector<8x128xf32>
    %c0_3 = arith.constant 0 : index
    %c0_4 = arith.constant 0 : index
    %3 = vector.load %arg2[%c0_3, %c0_4] : memref<1x128xf32, #tpu.memory_space<vmem>>, vector<1x128xf32>
    %4 = vector.broadcast %3 : vector<1x128xf32> to vector<8x128xf32>
    %5 = arith.addf %2, %4 : vector<8x128xf32>
    %cst_5 = arith.constant 0.000000e+00 : f32
    %6 = vector.broadcast %cst_5 : f32 to vector<8x128xf32>
    %7 = arith.maximumf %5, %6 : vector<8x128xf32>
    %c0_6 = arith.constant 0 : index
    %c0_7 = arith.constant 0 : index
    %8 = vector.load %arg3[%c0_6, %c0_7] : memref<128x128xf32, #tpu.memory_space<vmem>>, vector<128x128xf32>
    %cst_8 = arith.constant dense<0.000000e+00> : vector<8x128xf32>
    %9 = tpu.matmul %7, %8, %cst_8 {dimension_numbers = #tpu.dot_dimension_numbers<[1], [0], [0], [1], [0, 0, 1, 1], [], []>} : vector<8x128xf32>, vector<128x128xf32>, vector<8x128xf32> -> vector<8x128xf32>
    %c0_9 = arith.constant 0 : index
    %c0_10 = arith.constant 0 : index
    %10 = vector.load %arg4[%c0_9, %c0_10] : memref<1x128xf32, #tpu.memory_space<vmem>>, vector<1x128xf32>
    %11 = vector.broadcast %10 : vector<1x128xf32> to vector<8x128xf32>
    %12 = arith.addf %9, %11 : vector<8x128xf32>
    %13 = vector.extract_strided_slice %12 {offsets = [0, 0], sizes = [8, 4], strides = [1, 1]} : vector<8x128xf32> to vector<8x4xf32>
    %c0_11 = arith.constant 0 : index
    %c0_12 = arith.constant 0 : index
    %14 = vector.load %arg5[%c0_11, %c0_12] : memref<8x4xf32, #tpu.memory_space<vmem>>, vector<8x4xf32>
    tpu.vector_store %arg5[%c0_11, %c0_12], %13 {strides = array<i32>} : memref<8x4xf32, #tpu.memory_space<vmem>>, vector<8x4xf32>,
    return
  }
}

</mosaic_0001>

<bundles_post_ra>
// kernel: tpu_custom_call.1
= control target key start
LH: loop header
LB: loop body
LE: loop exit
PB: predicated region body
PF: predicated region fallthrough
CT: control target
= control target key end

     0   :  { %10 = vsyncpa [#allocation3], 0  ;;  %s504_s0 = inlined_call_operand.hbm [shape: f32[8,16], index: 0, kind: input, shape index: {}]   ;;  %s505_s1 = inlined_call_operand.hbm [shape: f32[16,128], index: 1, kind: input, shape index: {}]   ;;  %s506_s2 = inlined_call_operand.vmem [shape: f32[1,128], index: 2, kind: input, shape index: {}]   ;;  %s507_s3 = inlined_call_operand.hbm [shape: f32[128,128], index: 3, kind: input, shape index: {}]   ;;  %s508_s4 = inlined_call_operand.vmem [shape: f32[1,128], index: 4, kind: input, shape index: {}]   ;;  %s509_s5 = inlined_call_operand.vmem [shape: f32[8,4], index: 5, kind: output, shape index: {}]  }
   0x1   :  { %11 = vsyncpa [#allocation5], 0  ;;  %s415_s18 = smov [#allocation4]   ;;  %s345_s22 = scalar_lea.hbm %s505_s1, 256 }
   0x2   :  { %s27_s19 = sshll.u32 %s415_s18, 4  ;;  %p346_p0 = scmp.ne.s32.totalorder %s505_s1, %s345_s22  ;;  %s28_s19 = int_to_ptr.vmem [resolvable:$true] %s27_s19 }
   0x3   :  { %p349_p1 = scmp.lt.u32.totalorder %s345_s22, %s505_s1 }
   0x5   :  { %p351_p2 = pnand %p349_p1, %p346_p0 }
   0x7   :  { %354 = shalt.err (!%p351_p2)
}
   0x8   :  { %s355_s27 = scalar_lea.vmem %s28_s19, 256  ;;  %p360_p4 = scmp.lt.s32.totalorder %s28_s19, %s28_s19 }
   0x9   :  { %p356_p3 = scmp.ne.s32.totalorder %s28_s19, %s355_s27  ;;  %p361_p5 = scmp.lt.s32.totalorder %s355_s27, %s355_s27 }
   0xb   :  { %p362_p6 = por %p361_p5, %p360_p4 }
   0xd   :  { %p363_p7 = pnand %p362_p6, %p356_p3 }
   0xf   :  { %366 = shalt.err (!%p363_p7)
}
  0x10   :  { %s416_s28 = smov 128   ;;  %s417_s29 = smov 8  }
  0x11   :  { %33 = dma.hbm_to_vmem [thread:$0]  %s505_s1, 256, %s28_s19, [#allocation5], %s416_s28, %s416_s28, %s417_s29  }
  0x12   :  { %s418_s7 = smov [#allocation2]   ;;  %s419_s9 = smov [#allocation6]  }
  0x13   :  { %s18_s8 = sshll.u32 %s418_s7, 4  ;;  %s41_s10 = sshll.u32 %s419_s9, 4  ;;  %s19_s8 = int_to_ptr.vmem [resolvable:$true] %s18_s8  ;;  %s42_s10 = int_to_ptr.vmem [resolvable:$true] %s41_s10 }
  0x14   :  { %s367_s13 = scalar_lea.hbm %s504_s0, 128 }
  0x15   :  { %p368_p8 = scmp.ne.s32.totalorder %s504_s0, %s367_s13  ;;  %p371_p9 = scmp.lt.u32.totalorder %s367_s13, %s504_s0 }
  0x17   :  { %p373_p10 = pnand %p371_p9, %p368_p8 }
  0x19   :  { %376 = shalt.err (!%p373_p10)
}
  0x1a   :  { %s377_s1 = scalar_lea.vmem %s19_s8, 128  ;;  %p382_p12 = scmp.lt.s32.totalorder %s19_s8, %s19_s8 }
  0x1b   :  { %p378_p11 = scmp.ne.s32.totalorder %s19_s8, %s377_s1  ;;  %p383_p13 = scmp.lt.s32.totalorder %s377_s1, %s377_s1 }
  0x1d   :  { %p384_p0 = por %p383_p13, %p382_p12 }
  0x1f   :  { %p385_p1 = pnand %p384_p0, %p378_p11 }
  0x21   :  { %388 = shalt.err (!%p385_p1)
}
  0x22   :  { %21 = dma.hbm_to_vmem [thread:$0]  %s504_s0, 128, %s19_s8, [#allocation3]  }
  0x23   :  { %s389_s22 = scalar_lea.hbm %s507_s3, 2048 }
  0x24   :  { %p390_p2 = scmp.ne.s32.totalorder %s507_s3, %s389_s22  ;;  %p393_p3 = scmp.lt.u32.totalorder %s389_s22, %s507_s3 }
  0x26   :  { %p395_p4 = pnand %p393_p3, %p390_p2 }
  0x28   :  { %398 = shalt.err (!%p395_p4)
}
  0x29   :  { %s399_s27 = scalar_lea.vmem %s42_s10, 2048  ;;  %p404_p6 = scmp.lt.s32.totalorder %s42_s10, %s42_s10 }
  0x2a   :  { %p400_p5 = scmp.ne.s32.totalorder %s42_s10, %s399_s27  ;;  %p405_p7 = scmp.lt.s32.totalorder %s399_s27, %s399_s27 }
  0x2c   :  { %p406_p8 = por %p405_p7, %p404_p6 }
  0x2e   :  { %p407_p9 = pnand %p406_p8, %p400_p5 }
  0x30   :  { %410 = shalt.err (!%p407_p9)
}
  0x31   :  { %47 = dma.hbm_to_vmem [thread:$0]  %s507_s3, 2048, %s42_s10, [#allocation5], %s416_s28, %s416_s28, %s417_s29  }
  0x32   :  { %411 = dma.done.wait [#allocation3], 128  }
  0x33   :  { %412 = vsyncadd [#allocation3], 4294967168 }
  0x34   :  { %413 = dma.done.wait [#allocation5], 2304  }
  0x35   :  { %414 = vsyncadd [#allocation5], 4294964992  ;;  %v420_v0 = vmov 0.0|0.0   ;;  %vm421_vm0 = vmmov 0   ;;  %v422_v1 = vmov 0.0   ;;  %v60_v2 = vld [vmem:[#allocation4] sm:$0xff] }
  0x36   :  { %310 = vmatprep.subr.bf16.mxu0 %v420_v0  ;;  %272 = vmatprep.mubr.msk.f32.mxu0 %vm421_vm0, %v422_v1  ;;  %v61_v3 = vld [vmem:[#allocation4 + $0x8] sm:$0xff]  ;;  %v144_v5 = vld [vmem:[#allocation6] sm:$0xff]  ;;  %v145_v6 = vld [vmem:[#allocation6 + $0x8] sm:$0xff]  ;;  %vm69_vm1 = vcmask 130048   ;;  %vm237_vm2 = vcmask 31744  }
  0x37   :  { %313 = vmatprep.subr.bf16.mxu1 %v420_v0  ;;  %307 = vmatprep.mubr.msk.f32.mxu1 %vm421_vm0, %v422_v1  ;;  %v311_v4 = vpack.c.bf16 %v61_v3, %v60_v2  ;;  %v146_v7 = vld [vmem:[#allocation6 + $0x10] sm:$0xff]  ;;  %v314_v8 = vpack.c.bf16 %v145_v6, %v144_v5  ;;  %v147_v9 = vld [vmem:[#allocation6 + $0x18] sm:$0xff]  ;;  %v59_v10 = vld [vmem:[#allocation2] sm:$0xff] }
  0x38   :  { %v317_v11 = vpack.c.bf16 %v147_v9, %v146_v7  ;;  %v148_v12 = vld [vmem:[#allocation6 + $0x20] sm:$0xff]  ;;  %v149_v13 = vld [vmem:[#allocation6 + $0x28] sm:$0xff]  ;;  %v150_v15 = vld [vmem:[#allocation6 + $0x30] sm:$0xff] }
  0x39   :  { %312 = vmatpush3.bf16.msra.mxu0 %v311_v4  ;;  %315 = vmatpush3.bf16.msra.mxu1 %v314_v8  ;;  %v320_v14 = vpack.c.bf16 %v149_v13, %v148_v12  ;;  %v151_v16 = vld [vmem:[#allocation6 + $0x38] sm:$0xff]  ;;  %v152_v18 = vld [vmem:[#allocation6 + $0x40] sm:$0xff]  ;;  %v153_v19 = vld [vmem:[#allocation6 + $0x48] sm:$0xff] }
  0x3a   :  { %316 = vmatprep.subr.bf16.mxu1 %v420_v0  ;;  %v323_v17 = vpack.c.bf16 %v151_v16, %v150_v15  ;;  %v326_v20 = vpack.c.bf16 %v153_v19, %v152_v18  ;;  %v154_v21 = vld [vmem:[#allocation6 + $0x50] sm:$0xff]  ;;  %v155_v22 = vld [vmem:[#allocation6 + $0x58] sm:$0xff]  ;;  %v156_v24 = vld [vmem:[#allocation6 + $0x60] sm:$0xff] }
  0x3b   :  { %v329_v23 = vpack.c.bf16 %v155_v22, %v154_v21  ;;  %v157_v25 = vld [vmem:[#allocation6 + $0x68] sm:$0xff]  ;;  %v158_v27 = vld [vmem:[#allocation6 + $0x70] sm:$0xff]  ;;  %v159_v28 = vld [vmem:[#allocation6 + $0x78] sm:$0xff] }
  0x3c   :  { %273 = vmatmul.mubr.msk.f32.vlgmr.msra.gmra.mrb[0].mxu0 %vm69_vm1, %v59_v10  ;;  %v332_v26 = vpack.c.bf16 %v157_v25, %v156_v24  ;;  %v335_v29 = vpack.c.bf16 %v159_v28, %v158_v27  ;;  %v245_v30 = vld [vmem:[%s506_s2] ss:$0 sm:$0xff] }
  0x3d   :  { %318 = vmatpush3.bf16.msra.mxu1 %v317_v11  ;;  %v247_v35 = vld [vmem:[%s508_s4] ss:$0 sm:$0xff] }
  0x3e   :  { %319 = vmatprep.subr.bf16.mxu1 %v420_v0 }
  0x41   :  { %321 = vmatpush3.bf16.msra.mxu1 %v320_v14 }
  0x42   :  { %322 = vmatprep.subr.bf16.mxu1 %v420_v0 }
  0x45   :  { %324 = vmatpush3.bf16.msra.mxu1 %v323_v17 }
  0x46   :  { %325 = vmatprep.subr.bf16.mxu1 %v420_v0 }
  0x49   :  { %327 = vmatpush3.bf16.msra.mxu1 %v326_v20 }
  0x4a   :  { %328 = vmatprep.subr.bf16.mxu1 %v420_v0 }
  0x4d   :  { %330 = vmatpush3.bf16.msra.mxu1 %v329_v23 }
  0x4e   :  { %331 = vmatprep.subr.bf16.mxu1 %v420_v0 }
  0x51   :  { %333 = vmatpush3.bf16.msra.mxu1 %v332_v26 }
  0x52   :  { %334 = vmatprep.subr.bf16.mxu1 %v420_v0 }
  0x55   :  { %336 = vmatpush3.bf16.msra.mxu1 %v335_v29 }
 0x10f   :  { %v139_v31 = vpop.f32.mrb[0].mxu0 }
 0x110   :  { %v140_v32 = vadd.f32 %v245_v30, %v139_v31  ;;  %v274_v33 = vpop.f32.mrb[1].mxu0 }
 0x112   :  { %v143_v34 = vmax.f32 %v140_v32, 0.0 }
 0x114   :  { %308 = vmatmul.mubr.f32.vlgmr.msra.gmra.mrb[0].mxu1 %v143_v34 }
 0x1e7   :  { %v233_v36 = vpop.f32.mrb[0].mxu1 }
 0x1e8   :  { %v234_v37 = vadd.f32 %v247_v35, %v233_v36  ;;  %v309_v38 = vpop.f32.mrb[1].mxu1 }
 0x1ea   :  { %238 = vst.msk [vmem:[%s509_s5] sm:$0xff] %vm237_vm2, %v234_v37 }
 0x1eb   :  { %243 = vsyncpa [#allocation3], 1 }
 0x1ec   :  { %244 = vsyncpa [#allocation5], 1 }

</bundles_post_ra>
